<compile_context>
chip_gen: v6e
topology: v6e:2x2x1
jax: 0.10.0
libtpu: 0.0.40
codegen_flags: <defaults>
</compile_context>

<pallas_src>
import functools

import jax
import jax.numpy as jnp
from jax.experimental import pallas as pl
from jax.experimental.pallas import tpu as pltpu

DROPOUT_P = 0.2


def _round_up(n, m):
    return ((n + m - 1) // m) * m


def _ff_kernel(x_ref, rand_ref, w1_ref, b1_ref, w2_ref, b2_ref, o_ref,
               *, p, training):
    # ---- Linear 1 + ReLU (MXU bf16 -> f32 acc, VPU epilogue in f32) ----
    h = jnp.dot(x_ref[...], w1_ref[...],
                preferred_element_type=jnp.float32) + b1_ref[...]
    h = jnp.maximum(h, 0.0)

    # ---- Linear 2 (MXU bf16 -> f32 acc) ----
    y = jnp.dot(h.astype(w2_ref.dtype), w2_ref[...],
                preferred_element_type=jnp.float32) + b2_ref[...]

    # ---- Dropout (inverted, train mode only) ----
    if training and p > 0.0:
        # rand_ref holds uniform int32 bits; keep with prob (1 - p) by
        # comparing against a precomputed signed threshold (1 VPU compare).
        threshold = jnp.int32(int(round(p * (2 ** 32))) - 2 ** 31)
        keep = rand_ref[...] >= threshold
        y = jnp.where(keep, y * (1.0 / (1.0 - p)), 0.0)

    o_ref[...] = y.astype(o_ref.dtype)


def feed_forward(x, w1, b1, w2, b2, *, seed=0, training=True, p=DROPOUT_P):
    """x: (batch, seq, head_dim).  Weights stored as (in_features, out_features)
    (transposed vs. nn.Linear.weight), so the kernel computes y = x @ W + b."""
    batch, seq, d = x.shape
    hidden = w1.shape[1]
    assert w1.shape == (d, hidden) and w2.shape == (hidden, d)
    assert b1.shape == (hidden,) and b2.shape == (d,)

    # Lane-dense padded feature layout (multiples of 128 on the lane axis).
    d_pad = _round_up(d, 128)
    h_pad = _round_up(hidden, 128)

    # Row tiling: up to 256 rows per grid step, padded to a full tile.
    M = batch * seq
    tm = min(256, _round_up(M, 8))
    M_pad = _round_up(M, tm)

    x2 = jnp.pad(x.reshape(M, d).astype(jnp.bfloat16),
                 ((0, M_pad - M), (0, d_pad - d)))
    w1p = jnp.pad(w1.astype(jnp.bfloat16), ((0, d_pad - d), (0, h_pad - hidden)))
    w2p = jnp.pad(w2.astype(jnp.bfloat16), ((0, h_pad - hidden), (0, d_pad - d)))
    b1p = jnp.pad(b1.astype(jnp.float32).reshape(1, hidden),
                  ((0, 0), (0, h_pad - hidden)))
    b2p = jnp.pad(b2.astype(jnp.float32).reshape(1, d),
                  ((0, 0), (0, d_pad - d)))

    # Host-side dropout randomness (deterministic per seed); int32 bits.
    bits = jax.random.bits(jax.random.PRNGKey(seed), (M_pad, d_pad),
                           dtype=jnp.uint32)
    rand = jax.lax.bitcast_convert_type(bits, jnp.int32)

    kernel = functools.partial(_ff_kernel, p=float(p), training=bool(training))

    # Explicit VMEM budget: double-buffered row tiles + resident weights,
    # f32 hidden intermediate, plus headroom; capped at v7x's 64 MiB.
    vmem_bytes = (
        2 * tm * d_pad * (2 + 4 + 4)                       # x(bf16), rand, out
        + 2 * (2 * d_pad * h_pad * 2 + (h_pad + d_pad) * 4)  # W1/W2/b1/b2
        + tm * h_pad * 4                                   # hidden activations
        + (8 << 20)                                        # headroom
    )
    vmem_limit = int(min(max(vmem_bytes, 16 << 20), 64 << 20))

    out = pl.pallas_call(
        kernel,
        out_shape=jax.ShapeDtypeStruct((M_pad, d_pad), x.dtype),
        grid=(M_pad // tm,),
        in_specs=[
            pl.BlockSpec((tm, d_pad), lambda i: (i, 0)),      # x tile (bf16)
            pl.BlockSpec((tm, d_pad), lambda i: (i, 0)),      # dropout bits
            pl.BlockSpec((d_pad, h_pad), lambda i: (0, 0)),   # W1 (resident)
            pl.BlockSpec((1, h_pad), lambda i: (0, 0)),       # b1
            pl.BlockSpec((h_pad, d_pad), lambda i: (0, 0)),   # W2 (resident)
            pl.BlockSpec((1, d_pad), lambda i: (0, 0)),       # b2
        ],
        out_specs=pl.BlockSpec((tm, d_pad), lambda i: (i, 0)),
        compiler_params=pltpu.CompilerParams(
            dimension_semantics=("parallel",),
            vmem_limit_bytes=vmem_limit,
        ),
    )(x2, rand, w1p, b1p, w2p, b2p)

    return out[:M, :d].reshape(batch, seq, d)


def init_params(key, head_dim):
    """Deterministic init mirroring nn.Linear's U(-1/sqrt(fan_in), +...)."""
    hidden = 4 * head_dim
    k1, k2, k3, k4 = jax.random.split(key, 4)
    lim1 = 1.0 / jnp.sqrt(head_dim)
    lim2 = 1.0 / jnp.sqrt(hidden)
    w1 = jax.random.uniform(k1, (head_dim, hidden), jnp.float32, -lim1, lim1)
    b1 = jax.random.uniform(k2, (hidden,), jnp.float32, -lim1, lim1)
    w2 = jax.random.uniform(k3, (hidden, head_dim), jnp.float32, -lim2, lim2)
    b2 = jax.random.uniform(k4, (head_dim,), jnp.float32, -lim2, lim2)
    return w1, b1, w2, b2


if __name__ == "__main__":
    key = jax.random.PRNGKey(0)
    kx, kp = jax.random.split(key)

    batch, seq, head_dim = 2, 8, 32
    x = jax.random.normal(kx, (batch, seq, head_dim), dtype=jnp.float32)
    w1, b1, w2, b2 = init_params(kp, head_dim)

    # Eval mode (dropout = identity) vs. bf16-input / f32-accumulate reference.
    y_eval = feed_forward(x, w1, b1, w2, b2, training=False)
    jax.block_until_ready(y_eval)
    assert y_eval.shape == x.shape and y_eval.dtype == x.dtype

    xf = x.reshape(-1, head_dim).astype(jnp.bfloat16).astype(jnp.float32)
    w1f = w1.astype(jnp.bfloat16).astype(jnp.float32)
    w2f = w2.astype(jnp.bfloat16).astype(jnp.float32)
    h_ref = jnp.maximum(xf @ w1f + b1, 0.0)
    ref = (h_ref.astype(jnp.bfloat16).astype(jnp.float32) @ w2f + b2)
    ref = ref.reshape(x.shape)
    assert jnp.allclose(y_eval, ref, atol=1e-2, rtol=1e-2)

    # Train mode: deterministic dropout given the seed; kept entries must be
    # the eval output scaled by 1/(1-p), dropped entries must be zero.
    y_train = feed_forward(x, w1, b1, w2, b2, seed=0, training=True)
    jax.block_until_ready(y_train)
    assert y_train.shape == x.shape and y_train.dtype == x.dtype
    keep_mask = y_train != 0.0
    expected = jnp.where(keep_mask, y_eval * (1.0 / (1.0 - DROPOUT_P)), 0.0)
    assert jnp.allclose(y_train, expected, atol=1e-5, rtol=1e-5)

    print("KERNEL_OK")
</pallas_src>

<mosaic_0001>
module attributes {stable_mosaic.version = 11 : i64} {
  func.func @_ff_kernel(%arg0: i32, %arg1: memref<16x128xbf16, #tpu.memory_space<vmem>>, %arg2: memref<16x128xi32, #tpu.memory_space<vmem>>, %arg3: memref<128x128xbf16, #tpu.memory_space<vmem>>, %arg4: memref<1x128xf32, #tpu.memory_space<vmem>>, %arg5: memref<128x128xbf16, #tpu.memory_space<vmem>>, %arg6: memref<1x128xf32, #tpu.memory_space<vmem>>, %arg7: memref<16x128xf32, #tpu.memory_space<vmem>>) attributes {dimension_semantics = [#tpu.dimension_semantics<parallel>], iteration_bounds = array<i64: 1>, scalar_prefetch = 0 : i64, scratch_operands = 0 : i64, tpu.core_type = #tpu.core_type<tc>, window_params = [{transform_indices = @transform_0, window_bounds = array<i64: 16, 128>}, {transform_indices = @transform_1, window_bounds = array<i64: 16, 128>}, {pipeline_mode = #tpu.pipeline_mode<synchronous>, transform_indices = @transform_2, window_bounds = array<i64: 128, 128>}, {pipeline_mode = #tpu.pipeline_mode<synchronous>, transform_indices = @transform_3, window_bounds = array<i64: 1, 128>}, {pipeline_mode = #tpu.pipeline_mode<synchronous>, transform_indices = @transform_4, window_bounds = array<i64: 128, 128>}, {pipeline_mode = #tpu.pipeline_mode<synchronous>, transform_indices = @transform_5, window_bounds = array<i64: 1, 128>}, {transform_indices = @transform_6, window_bounds = array<i64: 16, 128>}]} {
    %c0 = arith.constant 0 : index
    %c0_0 = arith.constant 0 : index
    %0 = vector.load %arg1[%c0, %c0_0] : memref<16x128xbf16, #tpu.memory_space<vmem>>, vector<16x128xbf16>
    %c0_1 = arith.constant 0 : index
    %c0_2 = arith.constant 0 : index
    %1 = vector.load %arg3[%c0_1, %c0_2] : memref<128x128xbf16, #tpu.memory_space<vmem>>, vector<128x128xbf16>
    %cst = arith.constant dense<0.000000e+00> : vector<16x128xf32>
    %2 = tpu.matmul %0, %1, %cst {dimension_numbers = #tpu.dot_dimension_numbers<[1], [0], [0], [1], [0, 0, 1, 1], [], []>} : vector<16x128xbf16>, vector<128x128xbf16>, vector<16x128xf32> -> vector<16x128xf32>
    %c0_3 = arith.constant 0 : index
    %c0_4 = arith.constant 0 : index
    %3 = vector.load %arg4[%c0_3, %c0_4] : memref<1x128xf32, #tpu.memory_space<vmem>>, vector<1x128xf32>
    %4 = vector.broadcast %3 : vector<1x128xf32> to vector<16x128xf32>
    %5 = arith.addf %2, %4 : vector<16x128xf32>
    %cst_5 = arith.constant 0.000000e+00 : f32
    %6 = vector.broadcast %cst_5 : f32 to vector<16x128xf32>
    %7 = arith.maximumf %5, %6 : vector<16x128xf32>
    %8 = arith.truncf %7 : vector<16x128xf32> to vector<16x128xbf16>
    %c0_6 = arith.constant 0 : index
    %c0_7 = arith.constant 0 : index
    %9 = vector.load %arg5[%c0_6, %c0_7] : memref<128x128xbf16, #tpu.memory_space<vmem>>, vector<128x128xbf16>
    %cst_8 = arith.constant dense<0.000000e+00> : vector<16x128xf32>
    %10 = tpu.matmul %8, %9, %cst_8 {dimension_numbers = #tpu.dot_dimension_numbers<[1], [0], [0], [1], [0, 0, 1, 1], [], []>} : vector<16x128xbf16>, vector<128x128xbf16>, vector<16x128xf32> -> vector<16x128xf32>
    %c0_9 = arith.constant 0 : index
    %c0_10 = arith.constant 0 : index
    %11 = vector.load %arg6[%c0_9, %c0_10] : memref<1x128xf32, #tpu.memory_space<vmem>>, vector<1x128xf32>
    %12 = vector.broadcast %11 : vector<1x128xf32> to vector<16x128xf32>
    %13 = arith.addf %10, %12 : vector<16x128xf32>
    %c0_11 = arith.constant 0 : index
    %c0_12 = arith.constant 0 : index
    %14 = vector.load %arg7[%c0_11, %c0_12] : memref<16x128xf32, #tpu.memory_space<vmem>>, vector<16x128xf32>
    tpu.vector_store %arg7[%c0_11, %c0_12], %13 {strides = array<i32>} : memref<16x128xf32, #tpu.memory_space<vmem>>, vector<16x128xf32>,
    return
  }
  func.func @transform_0(%arg0: i32) -> (i32, i32) {
    %c0_i32 = arith.constant 0 : i32
    %c0_i32_0 = arith.constant 0 : i32
    return %arg0, %c0_i32 : i32, i32
  }
  func.func @transform_1(%arg0: i32) -> (i32, i32) {
    %c0_i32 = arith.constant 0 : i32
    %c0_i32_0 = arith.constant 0 : i32
    return %arg0, %c0_i32 : i32, i32
  }
  func.func @transform_2(%arg0: i32) -> (i32, i32) {
    %c0_i32 = arith.constant 0 : i32
    %c0_i32_0 = arith.constant 0 : i32
    %c0_i32_1 = arith.constant 0 : i32
    return %c0_i32, %c0_i32_0 : i32, i32
  }
  func.func @transform_3(%arg0: i32) -> (i32, i32) {
    %c0_i32 = arith.constant 0 : i32
    %c0_i32_0 = arith.constant 0 : i32
    %c0_i32_1 = arith.constant 0 : i32
    return %c0_i32, %c0_i32_0 : i32, i32
  }
  func.func @transform_4(%arg0: i32) -> (i32, i32) {
    %c0_i32 = arith.constant 0 : i32
    %c0_i32_0 = arith.constant 0 : i32
    %c0_i32_1 = arith.constant 0 : i32
    return %c0_i32, %c0_i32_0 : i32, i32
  }
  func.func @transform_5(%arg0: i32) -> (i32, i32) {
    %c0_i32 = arith.constant 0 : i32
    %c0_i32_0 = arith.constant 0 : i32
    %c0_i32_1 = arith.constant 0 : i32
    return %c0_i32, %c0_i32_0 : i32, i32
  }
  func.func @transform_6(%arg0: i32) -> (i32, i32) {
    %c0_i32 = arith.constant 0 : i32
    %c0_i32_0 = arith.constant 0 : i32
    return %arg0, %c0_i32 : i32, i32
  }
}

</mosaic_0001>

<bundles_post_ra>
// kernel: tpu_custom_call.1
= control target key start
LH: loop header
LB: loop body
LE: loop exit
PB: predicated region body
PF: predicated region fallthrough
CT: control target
= control target key end

     0   :  { %11 = vsyncpa [#allocation3], 0  ;;  %s622_s0 = inlined_call_operand.hbm [shape: bf16[16,128], index: 0, kind: input, shape index: {}]   ;;  %s623_s1 = inlined_call_operand.hbm [shape: s32[16,128], index: 1, kind: input, shape index: {}]   ;;  %s624_s2 = inlined_call_operand.hbm [shape: bf16[128,128], index: 2, kind: input, shape index: {}]   ;;  %s625_s3 = inlined_call_operand.vmem [shape: f32[1,128], index: 3, kind: input, shape index: {}]   ;;  %s626_s4 = inlined_call_operand.hbm [shape: bf16[128,128], index: 4, kind: input, shape index: {}]   ;;  %s627_s5 = inlined_call_operand.vmem [shape: f32[1,128], index: 5, kind: input, shape index: {}]   ;;  %s628_s6 = inlined_call_operand.hbm [shape: f32[16,128], index: 6, kind: output, shape index: {}]  }
   0x1   :  { %12 = vsyncpa [#allocation6], 0 }
   0x2   :  { %13 = vsyncpa [#allocation9], 0 }
   0x3   :  { %14 = vsyncpa [#allocation4], 0  ;;  %s549_s21 = smov [#allocation5]  }
   0x4   :  { %s32_s22 = sshll.u32 %s549_s21, 4  ;;  %s33_s22 = int_to_ptr.vmem [resolvable:$true] %s32_s22 }
   0x5   :  { %s449_s23 = scalar_lea.vmem %s33_s22, 256  ;;  %p454_p1 = scmp.lt.s32.totalorder %s33_s22, %s33_s22 }
   0x6   :  { %p450_p0 = scmp.ne.s32.totalorder %s33_s22, %s449_s23  ;;  %p455_p2 = scmp.lt.s32.totalorder %s449_s23, %s449_s23 }
   0x8   :  { %p456_p3 = por %p455_p2, %p454_p1 }
   0xa   :  { %p457_p4 = pnand %p456_p3, %p450_p0 }
   0xc   :  { %460 = shalt.err (!%p457_p4)
}
   0xd   :  { %s550_s24 = smov 128   ;;  %s551_s25 = smov 8  }
   0xe   :  { %38 = dma.hbm_to_vmem [thread:$0]  %s623_s1, 256, %s33_s22, [#allocation6], %s550_s24, %s550_s24, %s551_s25  }
   0xf   :  { %s552_s28 = smov [#allocation2]  }
  0x10   :  { %s20_s29 = sshll.u32 %s552_s28, 4  ;;  %s21_s29 = int_to_ptr.vmem [resolvable:$true] %s20_s29 }
  0x11   :  { %s469_s30 = scalar_lea.vmem %s21_s29, 128  ;;  %p474_p6 = scmp.lt.s32.totalorder %s21_s29, %s21_s29 }
  0x12   :  { %p470_p5 = scmp.ne.s32.totalorder %s21_s29, %s469_s30  ;;  %p475_p7 = scmp.lt.s32.totalorder %s469_s30, %s469_s30 }
  0x14   :  { %p476_p8 = por %p475_p7, %p474_p6 }
  0x16   :  { %p477_p9 = pnand %p476_p8, %p470_p5 }
  0x18   :  { %480 = shalt.err (!%p477_p9)
}
  0x19   :  { %s553_s7 = smov 64   ;;  %s554_s8 = smov 4  }
  0x1a   :  { %26 = dma.hbm_to_vmem [thread:$0]  %s622_s0, 128, %s21_s29, [#allocation3], %s553_s7, %s553_s7, %s554_s8  }
  0x1b   :  { %s555_s11 = smov [#allocation7]   ;;  %s556_s13 = smov [#allocation8]  }
  0x1c   :  { %s44_s12 = sshll.u32 %s555_s11, 4  ;;  %s58_s1 = sshll.u32 %s556_s13, 4  ;;  %s45_s12 = int_to_ptr.vmem [resolvable:$true] %s44_s12  ;;  %s59_s1 = int_to_ptr.vmem [resolvable:$true] %s58_s1 }
  0x1d   :  { %s489_s14 = scalar_lea.vmem %s45_s12, 1024  ;;  %p494_p11 = scmp.lt.s32.totalorder %s45_s12, %s45_s12 }
  0x1e   :  { %p490_p10 = scmp.ne.s32.totalorder %s45_s12, %s489_s14  ;;  %p495_p12 = scmp.lt.s32.totalorder %s489_s14, %s489_s14 }
  0x20   :  { %p496_p13 = por %p495_p12, %p494_p11 }
  0x22   :  { %p497_p0 = pnand %p496_p13, %p490_p10 }
  0x24   :  { %500 = shalt.err (!%p497_p0)
}
  0x25   :  { %50 = dma.hbm_to_vmem [thread:$0]  %s624_s2, 1024, %s45_s12, [#allocation6], %s553_s7, %s553_s7, %s554_s8  }
  0x26   :  { %s509_s17 = scalar_lea.vmem %s59_s1, 1024  ;;  %p514_p2 = scmp.lt.s32.totalorder %s59_s1, %s59_s1 }
  0x27   :  { %p510_p1 = scmp.ne.s32.totalorder %s59_s1, %s509_s17  ;;  %p515_p3 = scmp.lt.s32.totalorder %s509_s17, %s509_s17 }
  0x29   :  { %p516_p4 = por %p515_p3, %p514_p2 }
  0x2b   :  { %p517_p5 = pnand %p516_p4, %p510_p1 }
  0x2d   :  { %520 = shalt.err (!%p517_p5)
}
  0x2e   :  { %64 = dma.hbm_to_vmem [thread:$0]  %s626_s4, 1024, %s59_s1, [#allocation9], %s553_s7, %s553_s7, %s554_s8  }
  0x2f   :  { %541 = dma.done.wait [#allocation3], 128  }
  0x30   :  { %542 = vsyncadd [#allocation3], 4294967168 }
  0x31   :  { %543 = dma.done.wait [#allocation6], 1280  }
  0x32   :  { %544 = vsyncadd [#allocation6], 4294966016 }
  0x33   :  { %545 = dma.done.wait [#allocation9], 1024  }
  0x34   :  { %546 = vsyncadd [#allocation9], 4294966272  ;;  %v557_v0 = vmov 0.0   ;;  %vm558_vm0 = vmmov 0   ;;  %v424_v1 = vld [vmem:[#allocation7 + $0x38] sm:$0xff]   ;;  %v425_v2 = vld [vmem:[#allocation7 + $0x30] sm:$0xff]  }
  0x35   :  { %373 = vmatprep.subr.bf16.mxu0 %v557_v0  ;;  %389 = vmatprep.mubr.msk.bf16.mxu0 %vm558_vm0, %v557_v0  ;;  %v426_v3 = vld [vmem:[#allocation7 + $0x28] sm:$0xff]   ;;  %v433_v4 = vld [vmem:[#allocation8 + $0x38] sm:$0xff]   ;;  %v427_v5 = vld [vmem:[#allocation7 + $0x20] sm:$0xff]   ;;  %s559_s21 = smov [#allocation10]  }
  0x36   :  { %393 = vmatprep.subr.bf16.mxu1 %v557_v0  ;;  %409 = vmatprep.mubr.msk.bf16.mxu1 %vm558_vm0, %v557_v0  ;;  %v434_v6 = vld [vmem:[#allocation8 + $0x30] sm:$0xff]   ;;  %v428_v7 = vld [vmem:[#allocation7 + $0x18] sm:$0xff]   ;;  %v435_v8 = vld [vmem:[#allocation8 + $0x28] sm:$0xff]   ;;  %s322_s22 = sshll.u32 %s559_s21, 4  ;;  %s323_s22 = int_to_ptr.vmem [resolvable:$true] %s322_s22 }
  0x37   :  { %374 = vmatpush3.bf16.msra.mxu0 %v424_v1  ;;  %394 = vmatpush3.bf16.msra.mxu1 %v433_v4  ;;  %v429_v9 = vld [vmem:[#allocation7 + $0x10] sm:$0xff]   ;;  %v436_v10 = vld [vmem:[#allocation8 + $0x20] sm:$0xff]   ;;  %v430_v11 = vld [vmem:[#allocation7 + $0x8] sm:$0xff]   ;;  %p526_p7 = scmp.lt.s32.totalorder %s323_s22, %s323_s22 }
  0x38   :  { %375 = vmatprep.subr.bf16.mxu0 %v557_v0  ;;  %395 = vmatprep.subr.bf16.mxu1 %v557_v0  ;;  %v437_v12 = vld [vmem:[#allocation8 + $0x18] sm:$0xff]   ;;  %v431_v13 = vld [vmem:[#allocation7] sm:$0xff]   ;;  %v432_v14 = vld [vmem:[#allocation2] sm:$0xff]  }
  0x39   :  { %v438_v15 = vld [vmem:[#allocation8 + $0x10] sm:$0xff]   ;;  %v439_v16 = vld [vmem:[#allocation8 + $0x8] sm:$0xff]   ;;  %v440_v17 = vld [vmem:[#allocation8] sm:$0xff]  }
  0x3a   :  { %v336_v18 = vld [vmem:[%s625_s3] ss:$0 sm:$0xff]  ;;  %s521_s3 = scalar_lea.vmem %s323_s22, 256 }
  0x3b   :  { %376 = vmatpush3.bf16.msra.mxu0 %v425_v2  ;;  %396 = vmatpush3.bf16.msra.mxu1 %v434_v6  ;;  %v346_v28 = vld [vmem:[%s627_s5] ss:$0 sm:$0xff]  ;;  %p522_p6 = scmp.ne.s32.totalorder %s323_s22, %s521_s3  ;;  %p527_p8 = scmp.lt.s32.totalorder %s521_s3, %s521_s3 }
  0x3c   :  { %377 = vmatprep.subr.bf16.mxu0 %v557_v0  ;;  %397 = vmatprep.subr.bf16.mxu1 %v557_v0 }
  0x3d   :  { %p528_p9 = por %p527_p8, %p526_p7 }
  0x3f   :  { %378 = vmatpush3.bf16.msra.mxu0 %v426_v3  ;;  %398 = vmatpush3.bf16.msra.mxu1 %v435_v8  ;;  %p529_p10 = pnand %p528_p9, %p522_p6 }
  0x40   :  { %379 = vmatprep.subr.bf16.mxu0 %v557_v0  ;;  %399 = vmatprep.subr.bf16.mxu1 %v557_v0 }
  0x43   :  { %380 = vmatpush3.bf16.msra.mxu0 %v427_v5  ;;  %400 = vmatpush3.bf16.msra.mxu1 %v436_v10 }
  0x44   :  { %381 = vmatprep.subr.bf16.mxu0 %v557_v0  ;;  %401 = vmatprep.subr.bf16.mxu1 %v557_v0 }
  0x47   :  { %382 = vmatpush3.bf16.msra.mxu0 %v428_v7  ;;  %402 = vmatpush3.bf16.msra.mxu1 %v437_v12 }
  0x48   :  { %383 = vmatprep.subr.bf16.mxu0 %v557_v0  ;;  %403 = vmatprep.subr.bf16.mxu1 %v557_v0 }
  0x4b   :  { %384 = vmatpush3.bf16.msra.mxu0 %v429_v9  ;;  %404 = vmatpush3.bf16.msra.mxu1 %v438_v15 }
  0x4c   :  { %385 = vmatprep.subr.bf16.mxu0 %v557_v0  ;;  %405 = vmatprep.subr.bf16.mxu1 %v557_v0 }
  0x4f   :  { %386 = vmatpush3.bf16.msra.mxu0 %v430_v11  ;;  %406 = vmatpush3.bf16.msra.mxu1 %v439_v16 }
  0x50   :  { %387 = vmatprep.subr.bf16.mxu0 %v557_v0  ;;  %407 = vmatprep.subr.bf16.mxu1 %v557_v0 }
  0x53   :  { %388 = vmatpush3.bf16.msra.mxu0 %v431_v13  ;;  %408 = vmatpush3.bf16.msra.mxu1 %v440_v17 }
  0x56   :  { %390 = vmatmul.mubr.bf16.vlgmr.msra.gmra.mxu0 %v432_v14 }
 0x116   :  { %v193_v19 = vpop.f32.mrf.mxu0 }
 0x117   :  { %v194_v21 = vadd.f32 %v336_v18, %v193_v19 }
 0x118   :  { %v391_v20 = vpop.f32.mrf.mxu0 }
 0x119   :  { %v200_v25 = vmax.f32 %v194_v21, 0.0 }
 0x11a   :  { %v196_v22 = vpop.f32.mrf.mxu0 }
 0x11b   :  { %v197_v23 = vadd.f32 %v336_v18, %v196_v22 }
 0x11c   :  { %v392_v24 = vpop.f32.mrf.mxu0 }
 0x11d   :  { %v201_v26 = vmax.f32 %v197_v23, 0.0 }
 0x11f   :  { %v202_v27 = vpack.c.bf16 %v201_v26, %v200_v25 }
 0x121   :  { %410 = vmatmul.mubr.bf16.vlgmr.msra.gmra.mxu1 %v202_v27 }
 0x1e1   :  { %v308_v29 = vpop.f32.mrf.mxu1 }
 0x1e2   :  { %v309_v30 = vadd.f32 %v346_v28, %v308_v29 }
 0x1e3   :  { %v411_v31 = vpop.f32.mrf.mxu1 }
 0x1e4   :  { %315 = vst [vmem:[#allocation10] sm:$0xff] %v309_v30 }
 0x1e5   :  { %v311_v32 = vpop.f32.mrf.mxu1 }
 0x1e6   :  { %v312_v33 = vadd.f32 %v346_v28, %v311_v32 }
 0x1e7   :  { %v412_v34 = vpop.f32.mrf.mxu1 }
 0x1e8   :  { %316 = vst [vmem:[#allocation10 + $0x8] sm:$0xff] %v312_v33 }
 0x1e9   :  { %532 = shalt.err (!%p529_p10)
}
 0x1ea   :  { %328 = dma.vmem_to_hbm [thread:$0]  %s323_s22, 256, %s628_s6, [#allocation4], %s550_s24, %s550_s24, %s551_s25  }
 0x1eb   :  { %547 = dma.done.wait [#allocation4], 256  }
 0x1ec   :  { %548 = vsyncadd [#allocation4], 4294967040 }
 0x1ed   :  { %332 = vsyncpa [#allocation3], 1 }
 0x1ee   :  { %333 = vsyncpa [#allocation6], 1 }
 0x1ef   :  { %334 = vsyncpa [#allocation9], 1 }
 0x1f0   :  { %335 = vsyncpa [#allocation4], 1 }

</bundles_post_ra>
